<compile_context>
chip_gen: v5e
topology: v5e:2x2
jax: 0.10.0
libtpu: 0.0.40
codegen_flags: <defaults>
</compile_context>

<pallas_src>
import functools
import math

import jax
import jax.numpy as jnp
from jax.experimental import pallas as pl
from jax.experimental.pallas import tpu as pltpu


def _cdiv(a, b):
    return -(-a // b)


def _dwsep_kernel(x_cur_ref, x_halo_ref, w_ref, b_ref, o_ref, acc_ref, *, width):
    # x_cur_ref : (Cin, TS)      current row-tile, rows flattened onto lanes
    # x_halo_ref: (Cin, Bh)      flat continuation of the image after this tile
    # w_ref     : (9, Cout, Cin) depthwise folded into pointwise, one (Cout,Cin) per tap
    # b_ref     : (Cout, 1)      fused bias (f32)
    # o_ref     : (Cout, TS)
    # acc_ref   : (Cout, TS)     f32 accumulator scratch (re-initialized every
    #                            step, so it is correct on every core under
    #                            megacore "parallel" sharding)
    TS = x_cur_ref.shape[1]

    acc_ref[...] = jnp.broadcast_to(b_ref[...], acc_ref.shape)

    # Tap (kh, kw) is a lane shift of d = kh*W + kw in the flattened image.
    # Output column j of this tile needs x_flat[tile_start + j + d]:
    #   j <  TS - d -> current tile at column j + d
    #   j >= TS - d -> halo block at column j + d - TS   (first d halo columns)
    for kh in range(3):
        for kw in range(3):
            k = kh * 3 + kw
            d = kh * width + kw
            wk = w_ref[k]                                   # (Cout, Cin)
            if d == 0:
                acc_ref[...] += jnp.dot(
                    wk, x_cur_ref[...], preferred_element_type=jnp.float32)
            else:
                acc_ref[:, :TS - d] += jnp.dot(
                    wk, x_cur_ref[:, d:], preferred_element_type=jnp.float32)
                acc_ref[:, TS - d:] += jnp.dot(
                    wk, x_halo_ref[:, :d], preferred_element_type=jnp.float32)

    o_ref[...] = acc_ref[...].astype(o_ref.dtype)


def depthwise_separable_conv(x_nchw, dw_weight, dw_bias, pw_weight, pw_bias,
                             *, tile_rows=None):
    """PyTorch DepthwiseSeparableConv forward.

    x_nchw:    (N, Cin, H, W)
    dw_weight: (Cin, 1, 3, 3), dw_bias: (Cin,)
    pw_weight: (Cout, Cin, 1, 1), pw_bias: (Cout,)
    returns    (N, Cout, H-2, W-2)
    """
    N, Cin, H, W = x_nchw.shape
    Cout = pw_weight.shape[0]
    assert dw_weight.shape == (Cin, 1, 3, 3), dw_weight.shape
    assert pw_weight.shape == (Cout, Cin, 1, 1), pw_weight.shape
    assert H >= 3 and W >= 3, "3x3 valid conv needs H, W >= 3"
    Ho, Wo = H - 2, W - 2
    dtype = x_nchw.dtype
    itemsize = jnp.dtype(dtype).itemsize

    # Halo block: smallest multiple of 128 lanes covering the largest tap
    # offset (2*W + 2).  Row-tile granularity `step` makes TH*W a multiple of
    # Bh (and hence of 128 -> lane-dense blocks and unmasked stores).
    Bh = _cdiv(2 * W + 2, 128) * 128
    step = Bh // math.gcd(Bh, W)

    if tile_rows is None:
        # Target a few MiB per step (double-buffered in/out tiles + f32 acc).
        per_row = W * (2 * (Cin + Cout) * itemsize + 4 * Cout) + 1
        tile_rows = max(step, ((4 * 1024 * 1024) // per_row // step) * step)
    TH = max(step, _cdiv(tile_rows, step) * step)
    TH = min(TH, _cdiv(Ho, step) * step)          # never bigger than needed
    R = _cdiv(Ho, TH)                             # number of row tiles
    TS = TH * W                                   # lanes per tile (mult of 128)
    ratio = TS // Bh                              # Bh divides TS by construction
    Sp = R * TS + Bh                              # padded flat spatial length

    # ---- fuse depthwise into pointwise (parameter-sized prep, done once) ----
    dw = dw_weight[:, 0, :, :]                                 # (Cin, 3, 3)
    pw = pw_weight[:, :, 0, 0]                                 # (Cout, Cin)
    dw_k = jnp.transpose(dw, (1, 2, 0)).reshape(9, Cin)        # (9, Cin)
    w_fused = (pw[None, :, :] * dw_k[:, None, :]).astype(dtype)  # (9, Cout, Cin)
    b_fused = (pw.astype(jnp.float32) @ dw_bias.astype(jnp.float32)
               + pw_bias.astype(jnp.float32)).reshape(Cout, 1)

    # Flatten spatial and zero-pad ONCE in the wrapper (replaces the per-step
    # in-kernel staging copy); the pad also supplies the last tile's halo.
    x_flat = x_nchw.reshape(N, Cin, H * W)
    x_p = jnp.pad(x_flat, ((0, 0), (0, 0), (0, Sp - H * W)))

    kernel = functools.partial(_dwsep_kernel, width=W)

    out_flat = pl.pallas_call(
        kernel,
        out_shape=jax.ShapeDtypeStruct((N, Cout, R * TS), dtype),
        grid_spec=pltpu.PrefetchScalarGridSpec(
            num_scalar_prefetch=0,
            grid=(N, R),
            in_specs=[
                # current row tile: rows [r*TH, (r+1)*TH)
                pl.BlockSpec((None, Cin, TS), lambda n, r: (n, 0, r)),
                # halo: flat continuation starting at (r+1)*TS (Bh lanes)
                pl.BlockSpec((None, Cin, Bh), lambda n, r: (n, 0, (r + 1) * ratio)),
                pl.BlockSpec((9, Cout, Cin), lambda n, r: (0, 0, 0)),
                pl.BlockSpec((Cout, 1), lambda n, r: (0, 0)),
            ],
            out_specs=pl.BlockSpec((None, Cout, TS), lambda n, r: (n, 0, r)),
            scratch_shapes=[pltpu.VMEM((Cout, TS), jnp.float32)],
        ),
        compiler_params=pltpu.CompilerParams(
            dimension_semantics=("parallel", "parallel"),
            vmem_limit_bytes=32 * 1024 * 1024),
    )(x_p, x_p, w_fused, b_fused)

    # (N, Cout, R*TH*W) -> (N, Cout, R*TH, W) is free; crop the 2-pixel halo of
    # garbage columns (and padded bottom rows).
    return out_flat.reshape(N, Cout, R * TH, W)[:, :, :Ho, :Wo]


def _reference(x_nchw, dw_weight, dw_bias, pw_weight, pw_bias):
    Cin = x_nchw.shape[1]
    dn = ("NCHW", "OIHW", "NCHW")
    y = jax.lax.conv_general_dilated(
        x_nchw, dw_weight, window_strides=(1, 1), padding="VALID",
        dimension_numbers=dn, feature_group_count=Cin)
    y = y + dw_bias[None, :, None, None]
    z = jax.lax.conv_general_dilated(
        y, pw_weight, window_strides=(1, 1), padding="VALID",
        dimension_numbers=dn)
    return z + pw_bias[None, :, None, None]


if __name__ == "__main__":
    key = jax.random.PRNGKey(0)
    k_x, k_dw, k_dwb, k_pw, k_pwb = jax.random.split(key, 5)

    N, Cin, Cout, H, W = 2, 4, 8, 16, 16

    x = jax.random.normal(k_x, (N, Cin, H, W), jnp.float32)
    dw_weight = jax.random.uniform(k_dw, (Cin, 1, 3, 3), jnp.float32, -0.3, 0.3)
    dw_bias = jax.random.uniform(k_dwb, (Cin,), jnp.float32, -0.3, 0.3)
    pw_weight = jax.random.uniform(k_pw, (Cout, Cin, 1, 1), jnp.float32, -0.5, 0.5)
    pw_bias = jax.random.uniform(k_pwb, (Cout,), jnp.float32, -0.5, 0.5)

    # tile_rows=8 -> two row tiles per image, so the cross-tile halo path is
    # exercised even at this toy size.
    out = depthwise_separable_conv(x, dw_weight, dw_bias, pw_weight, pw_bias,
                                   tile_rows=8)
    out = jax.block_until_ready(out)

    ref = _reference(x, dw_weight, dw_bias, pw_weight, pw_bias)
    assert out.shape == (N, Cout, H - 2, W - 2), out.shape
    assert jnp.allclose(out, ref, atol=1e-4, rtol=1e-4), "mismatch vs reference"

    print("KERNEL_OK")
</pallas_src>

<mosaic_0001>
module attributes {stable_mosaic.version = 11 : i64} {
  func.func @_dwsep_kernel(%arg0: i32, %arg1: i32, %arg2: memref<1x4x128xf32, #tpu.memory_space<vmem>>, %arg3: memref<1x4x128xf32, #tpu.memory_space<vmem>>, %arg4: memref<9x8x4xf32, #tpu.memory_space<vmem>>, %arg5: memref<8x1xf32, #tpu.memory_space<vmem>>, %arg6: memref<1x8x128xf32, #tpu.memory_space<vmem>>, %arg7: memref<8x128xf32, #tpu.memory_space<vmem>>) attributes {dimension_semantics = [#tpu.dimension_semantics<parallel>, #tpu.dimension_semantics<parallel>], iteration_bounds = array<i64: 2, 2>, scalar_prefetch = 0 : i64, scratch_operands = 1 : i64, tpu.core_type = #tpu.core_type<tc>, window_params = [{transform_indices = @transform_0, window_bounds = array<i64: 1, 4, 128>}, {transform_indices = @transform_1, window_bounds = array<i64: 1, 4, 128>}, {pipeline_mode = #tpu.pipeline_mode<synchronous>, transform_indices = @transform_2, window_bounds = array<i64: 9, 8, 4>}, {pipeline_mode = #tpu.pipeline_mode<synchronous>, transform_indices = @transform_3, window_bounds = array<i64: 8, 1>}, {transform_indices = @transform_4, window_bounds = array<i64: 1, 8, 128>}]} {
    %c0 = arith.constant 0 : index
    %c0_0 = arith.constant 0 : index
    %0 = vector.load %arg5[%c0, %c0_0] : memref<8x1xf32, #tpu.memory_space<vmem>>, vector<8x1xf32>
    %1 = vector.shape_cast %0 : vector<8x1xf32> to vector<8x1xf32>
    %2 = vector.broadcast %1 : vector<8x1xf32> to vector<8x128xf32>
    %c0_1 = arith.constant 0 : index
    %c0_2 = arith.constant 0 : index
    %3 = vector.load %arg7[%c0_1, %c0_2] : memref<8x128xf32, #tpu.memory_space<vmem>>, vector<8x128xf32>
    tpu.vector_store %arg7[%c0_1, %c0_2], %2 {strides = array<i32>} : memref<8x128xf32, #tpu.memory_space<vmem>>, vector<8x128xf32>,
    %c0_3 = arith.constant 0 : index
    %c0_4 = arith.constant 0 : index
    %c0_5 = arith.constant 0 : index
    %4 = vector.load %arg4[%c0_3, %c0_4, %c0_5] : memref<9x8x4xf32, #tpu.memory_space<vmem>>, vector<1x8x4xf32>
    %5 = vector.shape_cast %4 : vector<1x8x4xf32> to vector<8x4xf32>
    %c0_6 = arith.constant 0 : index
    %c0_7 = arith.constant 0 : index
    %6 = vector.load %arg7[%c0_6, %c0_7] : memref<8x128xf32, #tpu.memory_space<vmem>>, vector<8x128xf32>
    %c0_8 = arith.constant 0 : index
    %c0_9 = arith.constant 0 : index
    %c0_10 = arith.constant 0 : index
    %7 = vector.load %arg2[%c0_8, %c0_9, %c0_10] : memref<1x4x128xf32, #tpu.memory_space<vmem>>, vector<1x4x128xf32>
    %8 = vector.shape_cast %7 : vector<1x4x128xf32> to vector<4x128xf32>
    %cst = arith.constant dense<0.000000e+00> : vector<8x128xf32>
    %9 = tpu.matmul %5, %8, %cst {dimension_numbers = #tpu.dot_dimension_numbers<[1], [0], [0], [1], [0, 0, 1, 1], [], []>} : vector<8x4xf32>, vector<4x128xf32>, vector<8x128xf32> -> vector<8x128xf32>
    %10 = arith.addf %6, %9 : vector<8x128xf32>
    %c0_11 = arith.constant 0 : index
    %c0_12 = arith.constant 0 : index
    %11 = vector.load %arg7[%c0_11, %c0_12] : memref<8x128xf32, #tpu.memory_space<vmem>>, vector<8x128xf32>
    tpu.vector_store %arg7[%c0_11, %c0_12], %10 {strides = array<i32>} : memref<8x128xf32, #tpu.memory_space<vmem>>, vector<8x128xf32>,
    %c1 = arith.constant 1 : index
    %c0_13 = arith.constant 0 : index
    %c0_14 = arith.constant 0 : index
    %12 = vector.load %arg4[%c1, %c0_13, %c0_14] : memref<9x8x4xf32, #tpu.memory_space<vmem>>, vector<1x8x4xf32>
    %13 = vector.shape_cast %12 : vector<1x8x4xf32> to vector<8x4xf32>
    %c0_15 = arith.constant 0 : index
    %c0_16 = arith.constant 0 : index
    %14 = vector.load %arg7[%c0_15, %c0_16] : memref<8x128xf32, #tpu.memory_space<vmem>>, vector<8x127xf32>
    %c0_17 = arith.constant 0 : index
    %c0_18 = arith.constant 0 : index
    %c1_19 = arith.constant 1 : index
    %15 = vector.load %arg2[%c0_17, %c0_18, %c1_19] : memref<1x4x128xf32, #tpu.memory_space<vmem>>, vector<1x4x127xf32>
    %16 = vector.shape_cast %15 : vector<1x4x127xf32> to vector<4x127xf32>
    %cst_20 = arith.constant dense<0.000000e+00> : vector<8x127xf32>
    %17 = tpu.matmul %13, %16, %cst_20 {dimension_numbers = #tpu.dot_dimension_numbers<[1], [0], [0], [1], [0, 0, 1, 1], [], []>} : vector<8x4xf32>, vector<4x127xf32>, vector<8x127xf32> -> vector<8x127xf32>
    %18 = arith.addf %14, %17 : vector<8x127xf32>
    %c0_21 = arith.constant 0 : index
    %c0_22 = arith.constant 0 : index
    %19 = vector.load %arg7[%c0_21, %c0_22] : memref<8x128xf32, #tpu.memory_space<vmem>>, vector<8x127xf32>
    tpu.vector_store %arg7[%c0_21, %c0_22], %18 {strides = array<i32>} : memref<8x128xf32, #tpu.memory_space<vmem>>, vector<8x127xf32>,
    %c0_23 = arith.constant 0 : index
    %c127 = arith.constant 127 : index
    %20 = vector.load %arg7[%c0_23, %c127] : memref<8x128xf32, #tpu.memory_space<vmem>>, vector<8x1xf32>
    %c0_24 = arith.constant 0 : index
    %c0_25 = arith.constant 0 : index
    %c0_26 = arith.constant 0 : index
    %21 = vector.load %arg3[%c0_24, %c0_25, %c0_26] : memref<1x4x128xf32, #tpu.memory_space<vmem>>, vector<1x4x1xf32>
    %22 = vector.shape_cast %21 : vector<1x4x1xf32> to vector<4x1xf32>
    %cst_27 = arith.constant dense<0.000000e+00> : vector<8x1xf32>
    %23 = tpu.matmul %13, %22, %cst_27 {dimension_numbers = #tpu.dot_dimension_numbers<[1], [0], [0], [1], [0, 0, 1, 1], [], []>} : vector<8x4xf32>, vector<4x1xf32>, vector<8x1xf32> -> vector<8x1xf32>
    %24 = arith.addf %20, %23 : vector<8x1xf32>
    %c0_28 = arith.constant 0 : index
    %c127_29 = arith.constant 127 : index
    %25 = vector.load %arg7[%c0_28, %c127_29] : memref<8x128xf32, #tpu.memory_space<vmem>>, vector<8x1xf32>
    tpu.vector_store %arg7[%c0_28, %c127_29], %24 {strides = array<i32>} : memref<8x128xf32, #tpu.memory_space<vmem>>, vector<8x1xf32>,
    %c2 = arith.constant 2 : index
    %c0_30 = arith.constant 0 : index
    %c0_31 = arith.constant 0 : index
    %26 = vector.load %arg4[%c2, %c0_30, %c0_31] : memref<9x8x4xf32, #tpu.memory_space<vmem>>, vector<1x8x4xf32>
    %27 = vector.shape_cast %26 : vector<1x8x4xf32> to vector<8x4xf32>
    %c0_32 = arith.constant 0 : index
    %c0_33 = arith.constant 0 : index
    %28 = vector.load %arg7[%c0_32, %c0_33] : memref<8x128xf32, #tpu.memory_space<vmem>>, vector<8x126xf32>
    %c0_34 = arith.constant 0 : index
    %c0_35 = arith.constant 0 : index
    %c2_36 = arith.constant 2 : index
    %29 = vector.load %arg2[%c0_34, %c0_35, %c2_36] : memref<1x4x128xf32, #tpu.memory_space<vmem>>, vector<1x4x126xf32>
    %30 = vector.shape_cast %29 : vector<1x4x126xf32> to vector<4x126xf32>
    %cst_37 = arith.constant dense<0.000000e+00> : vector<8x126xf32>
    %31 = tpu.matmul %27, %30, %cst_37 {dimension_numbers = #tpu.dot_dimension_numbers<[1], [0], [0], [1], [0, 0, 1, 1], [], []>} : vector<8x4xf32>, vector<4x126xf32>, vector<8x126xf32> -> vector<8x126xf32>
    %32 = arith.addf %28, %31 : vector<8x126xf32>
    %c0_38 = arith.constant 0 : index
    %c0_39 = arith.constant 0 : index
    %33 = vector.load %arg7[%c0_38, %c0_39] : memref<8x128xf32, #tpu.memory_space<vmem>>, vector<8x126xf32>
    tpu.vector_store %arg7[%c0_38, %c0_39], %32 {strides = array<i32>} : memref<8x128xf32, #tpu.memory_space<vmem>>, vector<8x126xf32>,
    %c0_40 = arith.constant 0 : index
    %c126 = arith.constant 126 : index
    %34 = vector.load %arg7[%c0_40, %c126] : memref<8x128xf32, #tpu.memory_space<vmem>>, vector<8x2xf32>
    %c0_41 = arith.constant 0 : index
    %c0_42 = arith.constant 0 : index
    %c0_43 = arith.constant 0 : index
    %35 = vector.load %arg3[%c0_41, %c0_42, %c0_43] : memref<1x4x128xf32, #tpu.memory_space<vmem>>, vector<1x4x2xf32>
    %36 = vector.shape_cast %35 : vector<1x4x2xf32> to vector<4x2xf32>
    %cst_44 = arith.constant dense<0.000000e+00> : vector<8x2xf32>
    %37 = tpu.matmul %27, %36, %cst_44 {dimension_numbers = #tpu.dot_dimension_numbers<[1], [0], [0], [1], [0, 0, 1, 1], [], []>} : vector<8x4xf32>, vector<4x2xf32>, vector<8x2xf32> -> vector<8x2xf32>
    %38 = arith.addf %34, %37 : vector<8x2xf32>
    %c0_45 = arith.constant 0 : index
    %c126_46 = arith.constant 126 : index
    %39 = vector.load %arg7[%c0_45, %c126_46] : memref<8x128xf32, #tpu.memory_space<vmem>>, vector<8x2xf32>
    tpu.vector_store %arg7[%c0_45, %c126_46], %38 {strides = array<i32>} : memref<8x128xf32, #tpu.memory_space<vmem>>, vector<8x2xf32>,
    %c3 = arith.constant 3 : index
    %c0_47 = arith.constant 0 : index
    %c0_48 = arith.constant 0 : index
    %40 = vector.load %arg4[%c3, %c0_47, %c0_48] : memref<9x8x4xf32, #tpu.memory_space<vmem>>, vector<1x8x4xf32>
    %41 = vector.shape_cast %40 : vector<1x8x4xf32> to vector<8x4xf32>
    %c0_49 = arith.constant 0 : index
    %c0_50 = arith.constant 0 : index
    %42 = vector.load %arg7[%c0_49, %c0_50] : memref<8x128xf32, #tpu.memory_space<vmem>>, vector<8x112xf32>
    %c0_51 = arith.constant 0 : index
    %c0_52 = arith.constant 0 : index
    %c16 = arith.constant 16 : index
    %43 = vector.load %arg2[%c0_51, %c0_52, %c16] : memref<1x4x128xf32, #tpu.memory_space<vmem>>, vector<1x4x112xf32>
    %44 = vector.shape_cast %43 : vector<1x4x112xf32> to vector<4x112xf32>
    %cst_53 = arith.constant dense<0.000000e+00> : vector<8x112xf32>
    %45 = tpu.matmul %41, %44, %cst_53 {dimension_numbers = #tpu.dot_dimension_numbers<[1], [0], [0], [1], [0, 0, 1, 1], [], []>} : vector<8x4xf32>, vector<4x112xf32>, vector<8x112xf32> -> vector<8x112xf32>
    %46 = arith.addf %42, %45 : vector<8x112xf32>
    %c0_54 = arith.constant 0 : index
    %c0_55 = arith.constant 0 : index
    %47 = vector.load %arg7[%c0_54, %c0_55] : memref<8x128xf32, #tpu.memory_space<vmem>>, vector<8x112xf32>
    tpu.vector_store %arg7[%c0_54, %c0_55], %46 {strides = array<i32>} : memref<8x128xf32, #tpu.memory_space<vmem>>, vector<8x112xf32>,
    %c0_56 = arith.constant 0 : index
    %c112 = arith.constant 112 : index
    %48 = vector.load %arg7[%c0_56, %c112] : memref<8x128xf32, #tpu.memory_space<vmem>>, vector<8x16xf32>
    %c0_57 = arith.constant 0 : index
    %c0_58 = arith.constant 0 : index
    %c0_59 = arith.constant 0 : index
    %49 = vector.load %arg3[%c0_57, %c0_58, %c0_59] : memref<1x4x128xf32, #tpu.memory_space<vmem>>, vector<1x4x16xf32>
    %50 = vector.shape_cast %49 : vector<1x4x16xf32> to vector<4x16xf32>
    %cst_60 = arith.constant dense<0.000000e+00> : vector<8x16xf32>
    %51 = tpu.matmul %41, %50, %cst_60 {dimension_numbers = #tpu.dot_dimension_numbers<[1], [0], [0], [1], [0, 0, 1, 1], [], []>} : vector<8x4xf32>, vector<4x16xf32>, vector<8x16xf32> -> vector<8x16xf32>
    %52 = arith.addf %48, %51 : vector<8x16xf32>
    %c0_61 = arith.constant 0 : index
    %c112_62 = arith.constant 112 : index
    %53 = vector.load %arg7[%c0_61, %c112_62] : memref<8x128xf32, #tpu.memory_space<vmem>>, vector<8x16xf32>
    tpu.vector_store %arg7[%c0_61, %c112_62], %52 {strides = array<i32>} : memref<8x128xf32, #tpu.memory_space<vmem>>, vector<8x16xf32>,
    %c4 = arith.constant 4 : index
    %c0_63 = arith.constant 0 : index
    %c0_64 = arith.constant 0 : index
    %54 = vector.load %arg4[%c4, %c0_63, %c0_64] : memref<9x8x4xf32, #tpu.memory_space<vmem>>, vector<1x8x4xf32>
    %55 = vector.shape_cast %54 : vector<1x8x4xf32> to vector<8x4xf32>
    %c0_65 = arith.constant 0 : index
    %c0_66 = arith.constant 0 : index
    %56 = vector.load %arg7[%c0_65, %c0_66] : memref<8x128xf32, #tpu.memory_space<vmem>>, vector<8x111xf32>
    %c0_67 = arith.constant 0 : index
    %c0_68 = arith.constant 0 : index
    %c17 = arith.constant 17 : index
    %57 = vector.load %arg2[%c0_67, %c0_68, %c17] : memref<1x4x128xf32, #tpu.memory_space<vmem>>, vector<1x4x111xf32>
    %58 = vector.shape_cast %57 : vector<1x4x111xf32> to vector<4x111xf32>
    %cst_69 = arith.constant dense<0.000000e+00> : vector<8x111xf32>
    %59 = tpu.matmul %55, %58, %cst_69 {dimension_numbers = #tpu.dot_dimension_numbers<[1], [0], [0], [1], [0, 0, 1, 1], [], []>} : vector<8x4xf32>, vector<4x111xf32>, vector<8x111xf32> -> vector<8x111xf32>
    %60 = arith.addf %56, %59 : vector<8x111xf32>
    %c0_70 = arith.constant 0 : index
    %c0_71 = arith.constant 0 : index
    %61 = vector.load %arg7[%c0_70, %c0_71] : memref<8x128xf32, #tpu.memory_space<vmem>>, vector<8x111xf32>
    tpu.vector_store %arg7[%c0_70, %c0_71], %60 {strides = array<i32>} : memref<8x128xf32, #tpu.memory_space<vmem>>, vector<8x111xf32>,
    %c0_72 = arith.constant 0 : index
    %c111 = arith.constant 111 : index
    %62 = vector.load %arg7[%c0_72, %c111] : memref<8x128xf32, #tpu.memory_space<vmem>>, vector<8x17xf32>
    %c0_73 = arith.constant 0 : index
    %c0_74 = arith.constant 0 : index
    %c0_75 = arith.constant 0 : index
    %63 = vector.load %arg3[%c0_73, %c0_74, %c0_75] : memref<1x4x128xf32, #tpu.memory_space<vmem>>, vector<1x4x17xf32>
    %64 = vector.shape_cast %63 : vector<1x4x17xf32> to vector<4x17xf32>
    %cst_76 = arith.constant dense<0.000000e+00> : vector<8x17xf32>
    %65 = tpu.matmul %55, %64, %cst_76 {dimension_numbers = #tpu.dot_dimension_numbers<[1], [0], [0], [1], [0, 0, 1, 1], [], []>} : vector<8x4xf32>, vector<4x17xf32>, vector<8x17xf32> -> vector<8x17xf32>
    %66 = arith.addf %62, %65 : vector<8x17xf32>
    %c0_77 = arith.constant 0 : index
    %c111_78 = arith.constant 111 : index
    %67 = vector.load %arg7[%c0_77, %c111_78] : memref<8x128xf32, #tpu.memory_space<vmem>>, vector<8x17xf32>
    tpu.vector_store %arg7[%c0_77, %c111_78], %66 {strides = array<i32>} : memref<8x128xf32, #tpu.memory_space<vmem>>, vector<8x17xf32>,
    %c5 = arith.constant 5 : index
    %c0_79 = arith.constant 0 : index
    %c0_80 = arith.constant 0 : index
    %68 = vector.load %arg4[%c5, %c0_79, %c0_80] : memref<9x8x4xf32, #tpu.memory_space<vmem>>, vector<1x8x4xf32>
    %69 = vector.shape_cast %68 : vector<1x8x4xf32> to vector<8x4xf32>
    %c0_81 = arith.constant 0 : index
    %c0_82 = arith.constant 0 : index
    %70 = vector.load %arg7[%c0_81, %c0_82] : memref<8x128xf32, #tpu.memory_space<vmem>>, vector<8x110xf32>
    %c0_83 = arith.constant 0 : index
    %c0_84 = arith.constant 0 : index
    %c18 = arith.constant 18 : index
    %71 = vector.load %arg2[%c0_83, %c0_84, %c18] : memref<1x4x128xf32, #tpu.memory_space<vmem>>, vector<1x4x110xf32>
    %72 = vector.shape_cast %71 : vector<1x4x110xf32> to vector<4x110xf32>
    %cst_85 = arith.constant dense<0.000000e+00> : vector<8x110xf32>
    %73 = tpu.matmul %69, %72, %cst_85 {dimension_numbers = #tpu.dot_dimension_numbers<[1], [0], [0], [1], [0, 0, 1, 1], [], []>} : vector<8x4xf32>, vector<4x110xf32>, vector<8x110xf32> -> vector<8x110xf32>
    %74 = arith.addf %70, %73 : vector<8x110xf32>
    %c0_86 = arith.constant 0 : index
    %c0_87 = arith.constant 0 : index
    %75 = vector.load %arg7[%c0_86, %c0_87] : memref<8x128xf32, #tpu.memory_space<vmem>>, vector<8x110xf32>
    tpu.vector_store %arg7[%c0_86, %c0_87], %74 {strides = array<i32>} : memref<8x128xf32, #tpu.memory_space<vmem>>, vector<8x110xf32>,
    %c0_88 = arith.constant 0 : index
    %c110 = arith.constant 110 : index
    %76 = vector.load %arg7[%c0_88, %c110] : memref<8x128xf32, #tpu.memory_space<vmem>>, vector<8x18xf32>
    %c0_89 = arith.constant 0 : index
    %c0_90 = arith.constant 0 : index
    %c0_91 = arith.constant 0 : index
    %77 = vector.load %arg3[%c0_89, %c0_90, %c0_91] : memref<1x4x128xf32, #tpu.memory_space<vmem>>, vector<1x4x18xf32>
    %78 = vector.shape_cast %77 : vector<1x4x18xf32> to vector<4x18xf32>
    %cst_92 = arith.constant dense<0.000000e+00> : vector<8x18xf32>
    %79 = tpu.matmul %69, %78, %cst_92 {dimension_numbers = #tpu.dot_dimension_numbers<[1], [0], [0], [1], [0, 0, 1, 1], [], []>} : vector<8x4xf32>, vector<4x18xf32>, vector<8x18xf32> -> vector<8x18xf32>
    %80 = arith.addf %76, %79 : vector<8x18xf32>
    %c0_93 = arith.constant 0 : index
    %c110_94 = arith.constant 110 : index
    %81 = vector.load %arg7[%c0_93, %c110_94] : memref<8x128xf32, #tpu.memory_space<vmem>>, vector<8x18xf32>
    tpu.vector_store %arg7[%c0_93, %c110_94], %80 {strides = array<i32>} : memref<8x128xf32, #tpu.memory_space<vmem>>, vector<8x18xf32>,
    %c6 = arith.constant 6 : index
    %c0_95 = arith.constant 0 : index
    %c0_96 = arith.constant 0 : index
    %82 = vector.load %arg4[%c6, %c0_95, %c0_96] : memref<9x8x4xf32, #tpu.memory_space<vmem>>, vector<1x8x4xf32>
    %83 = vector.shape_cast %82 : vector<1x8x4xf32> to vector<8x4xf32>
    %c0_97 = arith.constant 0 : index
    %c0_98 = arith.constant 0 : index
    %84 = vector.load %arg7[%c0_97, %c0_98] : memref<8x128xf32, #tpu.memory_space<vmem>>, vector<8x96xf32>
    %c0_99 = arith.constant 0 : index
    %c0_100 = arith.constant 0 : index
    %c32 = arith.constant 32 : index
    %85 = vector.load %arg2[%c0_99, %c0_100, %c32] : memref<1x4x128xf32, #tpu.memory_space<vmem>>, vector<1x4x96xf32>
    %86 = vector.shape_cast %85 : vector<1x4x96xf32> to vector<4x96xf32>
    %cst_101 = arith.constant dense<0.000000e+00> : vector<8x96xf32>
    %87 = tpu.matmul %83, %86, %cst_101 {dimension_numbers = #tpu.dot_dimension_numbers<[1], [0], [0], [1], [0, 0, 1, 1], [], []>} : vector<8x4xf32>, vector<4x96xf32>, vector<8x96xf32> -> vector<8x96xf32>
    %88 = arith.addf %84, %87 : vector<8x96xf32>
    %c0_102 = arith.constant 0 : index
    %c0_103 = arith.constant 0 : index
    %89 = vector.load %arg7[%c0_102, %c0_103] : memref<8x128xf32, #tpu.memory_space<vmem>>, vector<8x96xf32>
    tpu.vector_store %arg7[%c0_102, %c0_103], %88 {strides = array<i32>} : memref<8x128xf32, #tpu.memory_space<vmem>>, vector<8x96xf32>,
    %c0_104 = arith.constant 0 : index
    %c96 = arith.constant 96 : index
    %90 = vector.load %arg7[%c0_104, %c96] : memref<8x128xf32, #tpu.memory_space<vmem>>, vector<8x32xf32>
    %c0_105 = arith.constant 0 : index
    %c0_106 = arith.constant 0 : index
    %c0_107 = arith.constant 0 : index
    %91 = vector.load %arg3[%c0_105, %c0_106, %c0_107] : memref<1x4x128xf32, #tpu.memory_space<vmem>>, vector<1x4x32xf32>
    %92 = vector.shape_cast %91 : vector<1x4x32xf32> to vector<4x32xf32>
    %cst_108 = arith.constant dense<0.000000e+00> : vector<8x32xf32>
    %93 = tpu.matmul %83, %92, %cst_108 {dimension_numbers = #tpu.dot_dimension_numbers<[1], [0], [0], [1], [0, 0, 1, 1], [], []>} : vector<8x4xf32>, vector<4x32xf32>, vector<8x32xf32> -> vector<8x32xf32>
    %94 = arith.addf %90, %93 : vector<8x32xf32>
    %c0_109 = arith.constant 0 : index
    %c96_110 = arith.constant 96 : index
    %95 = vector.load %arg7[%c0_109, %c96_110] : memref<8x128xf32, #tpu.memory_space<vmem>>, vector<8x32xf32>
    tpu.vector_store %arg7[%c0_109, %c96_110], %94 {strides = array<i32>} : memref<8x128xf32, #tpu.memory_space<vmem>>, vector<8x32xf32>,
    %c7 = arith.constant 7 : index
    %c0_111 = arith.constant 0 : index
    %c0_112 = arith.constant 0 : index
    %96 = vector.load %arg4[%c7, %c0_111, %c0_112] : memref<9x8x4xf32, #tpu.memory_space<vmem>>, vector<1x8x4xf32>
    %97 = vector.shape_cast %96 : vector<1x8x4xf32> to vector<8x4xf32>
    %c0_113 = arith.constant 0 : index
    %c0_114 = arith.constant 0 : index
    %98 = vector.load %arg7[%c0_113, %c0_114] : memref<8x128xf32, #tpu.memory_space<vmem>>, vector<8x95xf32>
    %c0_115 = arith.constant 0 : index
    %c0_116 = arith.constant 0 : index
    %c33 = arith.constant 33 : index
    %99 = vector.load %arg2[%c0_115, %c0_116, %c33] : memref<1x4x128xf32, #tpu.memory_space<vmem>>, vector<1x4x95xf32>
    %100 = vector.shape_cast %99 : vector<1x4x95xf32> to vector<4x95xf32>
    %cst_117 = arith.constant dense<0.000000e+00> : vector<8x95xf32>
    %101 = tpu.matmul %97, %100, %cst_117 {dimension_numbers = #tpu.dot_dimension_numbers<[1], [0], [0], [1], [0, 0, 1, 1], [], []>} : vector<8x4xf32>, vector<4x95xf32>, vector<8x95xf32> -> vector<8x95xf32>
    %102 = arith.addf %98, %101 : vector<8x95xf32>
    %c0_118 = arith.constant 0 : index
    %c0_119 = arith.constant 0 : index
    %103 = vector.load %arg7[%c0_118, %c0_119] : memref<8x128xf32, #tpu.memory_space<vmem>>, vector<8x95xf32>
    tpu.vector_store %arg7[%c0_118, %c0_119], %102 {strides = array<i32>} : memref<8x128xf32, #tpu.memory_space<vmem>>, vector<8x95xf32>,
    %c0_120 = arith.constant 0 : index
    %c95 = arith.constant 95 : index
    %104 = vector.load %arg7[%c0_120, %c95] : memref<8x128xf32, #tpu.memory_space<vmem>>, vector<8x33xf32>
    %c0_121 = arith.constant 0 : index
    %c0_122 = arith.constant 0 : index
    %c0_123 = arith.constant 0 : index
    %105 = vector.load %arg3[%c0_121, %c0_122, %c0_123] : memref<1x4x128xf32, #tpu.memory_space<vmem>>, vector<1x4x33xf32>
    %106 = vector.shape_cast %105 : vector<1x4x33xf32> to vector<4x33xf32>
    %cst_124 = arith.constant dense<0.000000e+00> : vector<8x33xf32>
    %107 = tpu.matmul %97, %106, %cst_124 {dimension_numbers = #tpu.dot_dimension_numbers<[1], [0], [0], [1], [0, 0, 1, 1], [], []>} : vector<8x4xf32>, vector<4x33xf32>, vector<8x33xf32> -> vector<8x33xf32>
    %108 = arith.addf %104, %107 : vector<8x33xf32>
    %c0_125 = arith.constant 0 : index
    %c95_126 = arith.constant 95 : index
    %109 = vector.load %arg7[%c0_125, %c95_126] : memref<8x128xf32, #tpu.memory_space<vmem>>, vector<8x33xf32>
    tpu.vector_store %arg7[%c0_125, %c95_126], %108 {strides = array<i32>} : memref<8x128xf32, #tpu.memory_space<vmem>>, vector<8x33xf32>,
    %c8 = arith.constant 8 : index
    %c0_127 = arith.constant 0 : index
    %c0_128 = arith.constant 0 : index
    %110 = vector.load %arg4[%c8, %c0_127, %c0_128] : memref<9x8x4xf32, #tpu.memory_space<vmem>>, vector<1x8x4xf32>
    %111 = vector.shape_cast %110 : vector<1x8x4xf32> to vector<8x4xf32>
    %c0_129 = arith.constant 0 : index
    %c0_130 = arith.constant 0 : index
    %112 = vector.load %arg7[%c0_129, %c0_130] : memref<8x128xf32, #tpu.memory_space<vmem>>, vector<8x94xf32>
    %c0_131 = arith.constant 0 : index
    %c0_132 = arith.constant 0 : index
    %c34 = arith.constant 34 : index
    %113 = vector.load %arg2[%c0_131, %c0_132, %c34] : memref<1x4x128xf32, #tpu.memory_space<vmem>>, vector<1x4x94xf32>
    %114 = vector.shape_cast %113 : vector<1x4x94xf32> to vector<4x94xf32>
    %cst_133 = arith.constant dense<0.000000e+00> : vector<8x94xf32>
    %115 = tpu.matmul %111, %114, %cst_133 {dimension_numbers = #tpu.dot_dimension_numbers<[1], [0], [0], [1], [0, 0, 1, 1], [], []>} : vector<8x4xf32>, vector<4x94xf32>, vector<8x94xf32> -> vector<8x94xf32>
    %116 = arith.addf %112, %115 : vector<8x94xf32>
    %c0_134 = arith.constant 0 : index
    %c0_135 = arith.constant 0 : index
    %117 = vector.load %arg7[%c0_134, %c0_135] : memref<8x128xf32, #tpu.memory_space<vmem>>, vector<8x94xf32>
    tpu.vector_store %arg7[%c0_134, %c0_135], %116 {strides = array<i32>} : memref<8x128xf32, #tpu.memory_space<vmem>>, vector<8x94xf32>,
    %c0_136 = arith.constant 0 : index
    %c94 = arith.constant 94 : index
    %118 = vector.load %arg7[%c0_136, %c94] : memref<8x128xf32, #tpu.memory_space<vmem>>, vector<8x34xf32>
    %c0_137 = arith.constant 0 : index
    %c0_138 = arith.constant 0 : index
    %c0_139 = arith.constant 0 : index
    %119 = vector.load %arg3[%c0_137, %c0_138, %c0_139] : memref<1x4x128xf32, #tpu.memory_space<vmem>>, vector<1x4x34xf32>
    %120 = vector.shape_cast %119 : vector<1x4x34xf32> to vector<4x34xf32>
    %cst_140 = arith.constant dense<0.000000e+00> : vector<8x34xf32>
    %121 = tpu.matmul %111, %120, %cst_140 {dimension_numbers = #tpu.dot_dimension_numbers<[1], [0], [0], [1], [0, 0, 1, 1], [], []>} : vector<8x4xf32>, vector<4x34xf32>, vector<8x34xf32> -> vector<8x34xf32>
    %122 = arith.addf %118, %121 : vector<8x34xf32>
    %c0_141 = arith.constant 0 : index
    %c94_142 = arith.constant 94 : index
    %123 = vector.load %arg7[%c0_141, %c94_142] : memref<8x128xf32, #tpu.memory_space<vmem>>, vector<8x34xf32>
    tpu.vector_store %arg7[%c0_141, %c94_142], %122 {strides = array<i32>} : memref<8x128xf32, #tpu.memory_space<vmem>>, vector<8x34xf32>,
    %c0_143 = arith.constant 0 : index
    %c0_144 = arith.constant 0 : index
    %124 = vector.load %arg7[%c0_143, %c0_144] : memref<8x128xf32, #tpu.memory_space<vmem>>, vector<8x128xf32>
    %c0_145 = arith.constant 0 : index
    %c0_146 = arith.constant 0 : index
    %c0_147 = arith.constant 0 : index
    %125 = vector.load %arg6[%c0_145, %c0_146, %c0_147] : memref<1x8x128xf32, #tpu.memory_space<vmem>>, vector<1x8x128xf32>
    %126 = vector.shape_cast %125 : vector<1x8x128xf32> to vector<8x128xf32>
    %127 = vector.shape_cast %124 : vector<8x128xf32> to vector<1x8x128xf32>
    tpu.vector_store %arg6[%c0_145, %c0_146, %c0_147], %127 {strides = array<i32>} : memref<1x8x128xf32, #tpu.memory_space<vmem>>, vector<1x8x128xf32>,
    return
  }
  func.func @transform_0(%arg0: i32, %arg1: i32) -> (i32, i32, i32) {
    %c0_i32 = arith.constant 0 : i32
    %c0_i32_0 = arith.constant 0 : i32
    return %arg0, %c0_i32, %arg1 : i32, i32, i32
  }
  func.func @transform_1(%arg0: i32, %arg1: i32) -> (i32, i32, i32) {
    %c1_i32 = arith.constant 1 : i32
    %0 = arith.addi %arg1, %c1_i32 : i32
    %c1_i32_0 = arith.constant 1 : i32
    %1 = arith.muli %0, %c1_i32_0 : i32
    %c0_i32 = arith.constant 0 : i32
    %c0_i32_1 = arith.constant 0 : i32
    return %arg0, %c0_i32, %1 : i32, i32, i32
  }
  func.func @transform_2(%arg0: i32, %arg1: i32) -> (i32, i32, i32) {
    %c0_i32 = arith.constant 0 : i32
    %c0_i32_0 = arith.constant 0 : i32
    %c0_i32_1 = arith.constant 0 : i32
    %c0_i32_2 = arith.constant 0 : i32
    return %c0_i32, %c0_i32_0, %c0_i32_1 : i32, i32, i32
  }
  func.func @transform_3(%arg0: i32, %arg1: i32) -> (i32, i32) {
    %c0_i32 = arith.constant 0 : i32
    %c0_i32_0 = arith.constant 0 : i32
    %c0_i32_1 = arith.constant 0 : i32
    return %c0_i32, %c0_i32_0 : i32, i32
  }
  func.func @transform_4(%arg0: i32, %arg1: i32) -> (i32, i32, i32) {
    %c0_i32 = arith.constant 0 : i32
    %c0_i32_0 = arith.constant 0 : i32
    return %arg0, %c0_i32, %arg1 : i32, i32, i32
  }
}

</mosaic_0001>

<bundles_post_ra>
// kernel: tpu_custom_call.1
= control target key start
LH: loop header
LB: loop body
LE: loop exit
PB: predicated region body
PF: predicated region fallthrough
CT: control target
= control target key end

     0   :  { %9 = vsyncpa [#allocation4], 0  ;;  %s1445_s0 = inlined_call_operand.vmem [shape: f32[2,4,384], index: 0, kind: input, shape index: {}]   ;;  %s1446_s1 = inlined_call_operand.vmem [shape: f32[2,4,384], index: 1, kind: input, shape index: {}]   ;;  %s1447_s2 = inlined_call_operand.vmem [shape: f32[9,8,4], index: 2, kind: input, shape index: {}]   ;;  %s1448_s3 = inlined_call_operand.vmem [shape: f32[8,1], index: 3, kind: input, shape index: {}]   ;;  %s1449_s4 = inlined_call_operand.hbm [shape: f32[2,8,256], index: 4, kind: output, shape index: {}]  }
   0x1   :  { %11 = vsyncpa [#allocation4 + $0x1], 0  ;;  %s1218_s15 = smov 0   ;;  %s1220_s16 = smov 0  }
   0x2   :  { %s1222_s17 = smov 0   ;;  %s1224_s18 = smov 0  }
   0x3   :  { %s1226_s19 = smov 0   ;;  %s1228_s20 = smov 0  }
   0x4   :  { %s1230_s21 = smov 0   ;;  %s1232_s22 = smov 0  }
   0x5 LB: > { %s951_s23 = sadd.s32 4294967295, %s1182_s22   ;;  %s952_s24 = sadd.s32 4294967294, %s1182_s22   ;;  %s1182_s22 = sphi %s1232_s22, %s17_s22   ;;  %s1178_s21 = sphi %s1230_s21, %s1464_s21   ;;  %s1174_s20 = sphi %s1228_s20, %s1463_s20   ;;  %s1170_s19 = sphi %s1226_s19, %s1462_s19   ;;  %s1166_s18 = sphi %s1224_s18, %s1461_s18   ;;  %s1162_s17 = sphi %s1222_s17, %s1460_s17   ;;  %s1158_s16 = sphi %s1220_s16, %s1459_s16   ;;  %s1154_s15 = sphi %s1218_s15, %s1458_s15  }
   0x6   : > { %s26_s25 = sadd.s32 1, %s1174_s20  ;;  %s29_s26 = sadd.s32 1, %s1178_s21 }
   0x7   : > { %p27_p0 = scmp.ge.s32.totalorder %s26_s25, 2  ;;  %p148_p1 = scmp.ne.s32.totalorder %s1162_s17, %s1158_s16 }
   0x8   : > { %p149_p2 = scmp.eq.s32.totalorder %s951_s23, 3  ;;  %p154_p5 = scmp.ne.s32.totalorder %s1158_s16, %s1154_s15 }
   0x9   : > { %s1466_s25 = smov (%p27_p0, %s26_s25), 0  ;;  %s1468_s26 = smov (!%p27_p0, %s29_s26), %s1178_s21 }
   0xa   : > { %s134_s27 = ssub.s32 %s1174_s20, %s1466_s25  ;;  %p1269_p3 = por %p149_p2, %p148_p1 }
   0xb   : > { %p31_p4 = scmp.ge.s32.totalorder %s1468_s26, 2  ;;  %p155_p6 = scmp.eq.s32.totalorder %s952_s24, 3 }
   0xc   : > { %p955_p7 = scmp.ge.s32.totalorder %s1182_s22, 1  ;;  %p203_p9 = scmp.lt.s32.totalorder %s1182_s22, 5 }
   0xd   : > { %s1470_s26 = smov (%p31_p4, %s1468_s26), 0  ;;  %p1278_p8 = por %p155_p6, %p154_p5 }
   0xe   : > { %s133_s30 = ssub.s32 %s1178_s21, %s1470_s26  ;;  %s138_s5 = sadd.s32 1, %s1162_s17 }
   0xf   : > { %s135_s6 = sor.u32 %s134_s27, %s133_s30  ;;  %p204_p10 = pnand %p955_p7, %p203_p9 }
  0x10   : > { %p136_p11 = scmp.eq.s32.totalorder %s135_s6, 0  ;;  %p241_p12 = scmp.lt.s32.totalorder (!%p204_p10), %s1170_s19, 1 }
  0x11   : > { %207 = sbr.rel (%p204_p10) target bundleno = 435 (0x1b3), region = 36  ;;  %p243_p13 = scmp.lt.s32.totalorder (!%p204_p10), %s1166_s18, 2 }
  0x12   : > { %s1287_s7 = scalar_select %p136_p11, %s1162_s17, %s138_s5  }
  0x13   : > { %s249_s8 = sadd.s32 (!%p204_p10), 1, %s1166_s18  ;;  %s1185_s5 = smov (!%p204_p10), 127  }
  0x14   : > { %p252_p0 = scmp.lt.s32.totalorder (!%p204_p10), %s249_s8, 2 }
  0x16   : > { %s242_s9 = scalar_select %p241_p12, %s1170_s19, 1  ;;  %v1184_v0 = vmov 0   ;;  %v266_v2 = vld [vmem:[%s1447_s2] sm:$0xff]  ;;  %vm273_vm0 = vcmask 1043456   ;;  %vm269_vm1 = vcmask 31744   ;;  %v961_v6 = vld [vmem:[%s1447_s2 + $0x8] sm:$0xff] }
  0x17   : > { %1087 = vset.pattern.permute.xlu0 %v1184_v0  ;;  %s244_s10 = scalar_select %p243_p13, %s1166_s18, 2  ;;  %v966_v14 = vld [vmem:[%s1447_s2 + $0x10] sm:$0xff]  ;;  %v971_v17 = vld [vmem:[%s1447_s2 + $0x18] sm:$0xff]  ;;  %v259_v18 = vld [vmem:[%s1448_s3] sm:$0xff]  ;;  %vm332_vm2 = vcmask 1039360   ;;  %vm364_vm3 = vcmask 1048568  }
  0x18   : > { %s1006_s11 = smul.u32 3, %s242_s9  ;;  %s1472_s8 = smov (!%p252_p0, %s249_s8), 2  ;;  %v976_v20 = vld [vmem:[%s1447_s2 + $0x20] sm:$0xff]  ;;  %v981_v21 = vld [vmem:[%s1447_s2 + $0x28] sm:$0xff]  ;;  %v986_v22 = vld [vmem:[%s1447_s2 + $0x30] sm:$0xff]  ;;  %vm399_vm4 = vcmask 1031168  }
  0x19   : > { %s1186_s9 = smov 112   ;;  %v991_v24 = vld [vmem:[%s1447_s2 + $0x38] sm:$0xff]  ;;  %v996_v27 = vld [vmem:[%s1447_s2 + $0x40] sm:$0xff]  ;;  %vm431_vm5 = vcmask 1048560   ;;  %vm466_vm6 = vcmask 916480   ;;  %vm498_vm7 = vcmask 1048448  }
  0x1a   : > { %s246_s12 = sadd.s32 %s1006_s11, %s244_s10  ;;  %s255_s6 = sadd.s32 %s1006_s11, %s1472_s8  ;;  %vm533_vm8 = vcmask 908288   ;;  %vm565_vm9 = vcmask 1048440   ;;  %vm600_vm10 = vcmask 900096   ;;  %vm632_vm11 = vcmask 1048432  }
  0x1b   : > { %s957_s13 = sshll.u32 %s246_s12, 2  ;;  %s958_s10 = sshll.u32 %s255_s6, 2  ;;  %vm667_vm12 = vcmask 785408   ;;  %vm699_vm13 = vcmask 1048320   ;;  %vm734_vm14 = vcmask 777216   ;;  %vm766_vm15 = vcmask 1048312  }
  0x1c   : > { %s1297_s24 = scalar_lea.vmem %s1445_s0, %s957_s13  ;;  %s1450_s12 = smov 110  }
  0x1d   : > { %v302_v1 = vld [vmem:[%s1297_s24] sm:$0xf]  ;;  %s1314_s8 = scalar_lea.vmem %s1446_s1, %s958_s10  ;;  %s1188_s6 = smov 126  }
  0x1e   : > { %304 = vrot.lane.b32.xlu0 %v302_v1, %s1185_s5  ;;  %v436_v3 = vld [vmem:[%s1297_s24] sm:$0xf]  ;;  %s1189_s10 = smov 111   ;;  %s1451_s13 = smov 96  }
  0x1f   : > { %v268_v4 = vld [vmem:[%s1297_s24] sm:$0xf]  ;;  %438 = vrot.lane.b32.xlu1 %v436_v3, %s1186_s9 }
  0x20   : > { %959 = vmatpush.msk.msra.mxu0 %vm273_vm0, %v268_v4  ;;  %v570_v5 = vld [vmem:[%s1297_s24] sm:$0xf] }
  0x21   : > { %960 = vmatmul.msk.f32.vlgmr.msra.gmra.mxu0 %vm269_vm1, %v266_v2  ;;  %572 = vrot.lane.b32.xlu2 %v570_v5, %s1450_s12  ;;  %v335_v7 = vld [vmem:[%s1314_s8] sm:$0xf] }
  0x22   : > { %v469_v8 = vld [vmem:[%s1314_s8] sm:$0xf]  ;;  %964 = vmatpush.msk.msra.mxu2 %vm273_vm0, %v335_v7 }
  0x23   : > { %v402_v9 = vld [vmem:[%s1314_s8] sm:$0xf]  ;;  %965 = vmatmul.msk.f32.vlgmr.msra.gmra.mxu2 %vm269_vm1, %v961_v6 }
  0x24   : > { %v369_v10 = vld [vmem:[%s1297_s24] sm:$0xf]  ;;  %969 = vmatpush.msk.msrb.mxu0 %vm273_vm0, %v402_v9  ;;  %974 = vmatpush.msk.msrb.mxu2 %vm273_vm0, %v469_v8 }
  0x25   : > { %v536_v11 = vld [vmem:[%s1314_s8] sm:$0xf] }
  0x26   : > { %v603_v12 = vld [vmem:[%s1314_s8] sm:$0xf]  ;;  %979 = vmatpush.msk.msra.mxu0 %vm273_vm0, %v536_v11  ;;  %371 = vrot.lane.b32.xlu0 %v369_v10, %s1188_s6 }
  0x27   : > { %v503_v13 = vld [vmem:[%s1297_s24] sm:$0xf]  ;;  %984 = vmatpush.msk.msra.mxu2 %vm273_vm0, %v603_v12 }
  0x28   : > { %v637_v15 = vld [vmem:[%s1297_s24] sm:$0xf]  ;;  %505 = vrot.lane.b32.xlu1 %v503_v13, %s1189_s10 }
  0x29   : > { %v670_v16 = vld [vmem:[%s1314_s8] sm:$0xf]  ;;  %970 = vmatmul.msk.f32.vlgmr.msrb.gmra.mxu0 %vm269_vm1, %v966_v14  ;;  %639 = vrot.lane.b32.xlu2 %v637_v15, %s1451_s13  ;;  %s1452_s13 = smov 95  }
  0x2a   : > { %989 = vmatpush.msk.msrb.mxu0 %vm273_vm0, %v670_v16  ;;  %v704_v19 = vld [vmem:[%s1297_s24] sm:$0xf] }
  0x2b   : > { %975 = vmatmul.msk.f32.vlgmr.msrb.gmra.mxu2 %vm269_vm1, %v971_v17  ;;  %v737_v23 = vld [vmem:[%s1314_s8] sm:$0xf] }
  0x2c   : > { %994 = vmatpush.msk.msrb.mxu2 %vm273_vm0, %v737_v23  ;;  %v771_v25 = vld [vmem:[%s1297_s24] sm:$0xf]  ;;  %s1455_s24 = smov 96  }
  0x2d   : > { %v804_v26 = vld [vmem:[%s1314_s8] sm:$0xf]  ;;  %s1456_s8 = smov 110  }
  0x2e   : > { %262 = vperm.xlu0 %1087, %v259_v18  }
  0x30   : > { %706 = vrot.lane.b32.xlu1 %v704_v19, %s1452_s13  ;;  %s1192_s13 = smov 94  }
  0x31   : > { %980 = vmatmul.msk.f32.vlgmr.msra.gmra.mxu0 %vm269_vm1, %v976_v20  ;;  %773 = vrot.lane.b32.xlu2 %v771_v25, %s1192_s13 }
  0x32   : > { %999 = vmatpush.msk.msra.mxu0 %vm273_vm0, %v804_v26 }
  0x33   : > { %985 = vmatmul.msk.f32.vlgmr.msra.gmra.mxu2 %vm269_vm1, %v981_v21 }
  0x39   : > { %990 = vmatmul.msk.f32.vlgmr.msrb.gmra.mxu0 %vm269_vm1, %v986_v22 }
  0x3b   : > { %995 = vmatmul.msk.f32.vlgmr.msrb.gmra.mxu2 %vm269_vm1, %v991_v24 }
  0x41   : > { %1000 = vmatmul.msk.f32.vlgmr.msra.gmra.mxu0 %vm269_vm1, %v996_v27 }
  0x7b   : > { %v573_v30 = vpop.permute.xlu2 %572 }
  0x83   : > { %v640_v33 = vpop.permute.xlu2 %639 }
  0x8b   : > { %v774_v44 = vpop.permute.xlu2 %773 }
  0x90   : > { %v305_v28 = vpop.permute.xlu0 %304 }
  0x91   : > { %962 = vmatpush.msk.msra.mxu1 %vm273_vm0, %v305_v28  ;;  %v439_v29 = vpop.permute.xlu1 %438 }
  0x92   : > { %963 = vmatmul.msk.f32.vlgmr.msra.gmra.mxu1 %vm269_vm1, %v961_v6 }
  0x93   : > { %972 = vmatpush.msk.msrb.mxu1 %vm273_vm0, %v439_v29 }
  0x95   : > { %982 = vmatpush.msk.msra.mxu1 %vm273_vm0, %v573_v30 }
  0x98   : > { %v372_v31 = vpop.permute.xlu0 %371 }
  0x99   : > { %967 = vmatpush.msk.msra.mxu3 %vm273_vm0, %v372_v31 }
  0x9a   : > { %v506_v32 = vpop.permute.xlu1 %505  ;;  %968 = vmatmul.msk.f32.vlgmr.msra.gmra.mxu3 %vm269_vm1, %v966_v14  ;;  %973 = vmatmul.msk.f32.vlgmr.msrb.gmra.mxu1 %vm269_vm1, %v971_v17 }
  0x9b   : > { %977 = vmatpush.msk.msrb.mxu3 %vm273_vm0, %v506_v32 }
  0x9d   : > { %987 = vmatpush.msk.msra.mxu3 %vm273_vm0, %v640_v33 }
  0x9e   : > { %v294_v34 = vpop.f32.mrf.mxu0 }
  0xa0   : > { %v263_v35 = vpop.permute.xlu0 %262 }
  0xa1   : > { %v297_v36 = vadd.f32 %v294_v34, %v263_v35 }
  0xa2   : > { %v707_v37 = vpop.permute.xlu1 %706  ;;  %978 = vmatmul.msk.f32.vlgmr.msrb.gmra.mxu3 %vm269_vm1, %v976_v20  ;;  %983 = vmatmul.msk.f32.vlgmr.msra.gmra.mxu1 %vm269_vm1, %v981_v21 }
  0xa3   : > { %298 = vst [vmem:[#allocation2] sm:$0xff] %v297_v36  ;;  %992 = vmatpush.msk.msrb.mxu1 %vm273_vm0, %v707_v37  ;;  %997 = vmatpush.msk.msrb.mxu3 %vm273_vm0, %v774_v44  ;;  %vm801_vm0 = vcmask 769024  }
  0xa6   : > { %v423_v38 = vpop.f32.mrf.mxu0  ;;  %v356_v39 = vpop.f32.mrf.mxu2 }
  0xa7   : > { %427 = vrot.lane.b32.xlu2 %v423_v38, %s1188_s6  ;;  %360 = vrot.lane.b32.xlu1 %v356_v39, %s1185_s5  ;;  %s1457_s5 = smov 95   ;;  %s238_s6 = sand.u32 1, %s1158_s16  }
  0xaa   : > { %988 = vmatmul.msk.f32.vlgmr.msra.gmra.mxu3 %vm269_vm1, %v986_v22  ;;  %993 = vmatmul.msk.f32.vlgmr.msrb.gmra.mxu1 %vm269_vm1, %v991_v24 }
  0xae   : > { %v557_v40 = vpop.f32.mrf.mxu0  ;;  %v490_v41 = vpop.f32.mrf.mxu2 }
  0xaf   : > { %494 = vrot.lane.b32.xlu0 %v490_v41, %s1186_s9  ;;  %561 = vrot.lane.b32.xlu1 %v557_v40, %s1189_s10  ;;  %s1002_s9 = sshll.u32 %s1170_s19, 1 }
  0xb0   : > { %s848_s10 = sadd.s32 %s1166_s18, %s1002_s9  ;;  %s838_s18 = scalar_lea.sflag [#allocation4], %s238_s6 }
  0xb1   : > { %s1003_s23 = sshll.u32 %s848_s10, 3  ;;  %s1108_s10 = scalar_lea.hbm %s1449_s4, 32 }
  0xb2   : > { %998 = vmatmul.msk.f32.vlgmr.msrb.gmra.mxu3 %vm269_vm1, %v996_v27  ;;  %vm833_vm1 = vcmask 1048304   ;;  %s850_s30 = scalar_lea.hbm %s1449_s4, %s1003_s23 }
  0xb6   : > { %v691_v42 = vpop.f32.mrf.mxu0  ;;  %v624_v43 = vpop.f32.mrf.mxu2 }
  0xb7   : > { %695 = vrot.lane.b32.xlu0 %v691_v42, %s1455_s24  ;;  %628 = vrot.lane.b32.xlu2 %v624_v43, %s1456_s8  ;;  %s854_s24 = sshll.u32 %s850_s30, 4  ;;  %s855_s24 = int_to_ptr.hbm [resolvable:$true] %s854_s24 }
  0xb8   : > { %s1102_s19 = sshra.s32 %s855_s24, 4  ;;  %s1103_s19 = int_to_ptr.hbm [resolvable:$true] %s1102_s19 }
  0xb9   : > { %s1104_s8 = scalar_lea.hbm %s1103_s19, 8  ;;  %p1109_p5 = scmp.lt.s32.totalorder %s1103_s19, %s1449_s4 }
  0xba   : > { %p1105_p1 = scmp.ne.s32.totalorder %s1103_s19, %s1104_s8  ;;  %p1110_p6 = scmp.lt.s32.totalorder %s1108_s10, %s1104_s8 }
  0xbc   : > { %p1106_p2 = pnand %p1105_p1, %p1269_p3  ;;  %p1111_p7 = por %p1110_p6, %p1109_p5 }
  0xbe   : > { %v758_v45 = vpop.f32.mrf.mxu2  ;;  %v825_v54 = vpop.f32.mrf.mxu0  ;;  %p1107_p4 = pneg %p1106_p2 }
  0xbf   : > { %762 = vrot.lane.b32.xlu1 %v758_v45, %s1457_s5  ;;  %829 = vrot.lane.b32.xlu2 %v825_v54, %s1192_s13  ;;  %s956_s13 = sshll.u32 %s238_s6, 3 }
  0xc0   : > { %s240_s14 = scalar_lea.vmem [#allocation3], %s956_s13  ;;  %p1112_p9 = pnand %p1111_p7, %p1107_p4 }
  0xc1   : > { %s852_s11 = sshll.u32 %s240_s14, 4  ;;  %s853_s11 = int_to_ptr.vmem [resolvable:$true] %s852_s11 }
 0x101   : > { %v428_v55 = vpop.permute.xlu2 %427 }
 0x10f   : > { %v328_v46 = vpop.f32.mrf.mxu1 }
 0x110   : > { %v331_v47 = vadd.f32 %v328_v46, %v297_v36 }
 0x111   : > { %v629_v9 = vpop.permute.xlu2 %628 }
 0x112   : > { %333 = vst.msk [vmem:[#allocation2] sm:$0xff] %vm332_vm2, %v331_v47 }
 0x117   : > { %v462_v58 = vpop.f32.mrf.mxu1 }
 0x119   : > { %v334_v48 = vld [vmem:[#allocation2] sm:$0xff]  ;;  %v361_v49 = vpop.permute.xlu1 %360  ;;  %v830_v27 = vpop.permute.xlu2 %829 }
 0x11a   : > { %v363_v50 = vadd.f32 %v361_v49, %v334_v48 }
 0x11c   : > { %365 = vst.msk [vmem:[#allocation2] sm:$0xff] %vm364_vm3, %v363_v50 }
 0x11d   : > { %v395_v51 = vpop.f32.mrf.mxu3 }
 0x11f   : > { %v596_v6 = vpop.f32.mrf.mxu1 }
 0x121   : > { %v495_v61 = vpop.permute.xlu0 %494  ;;  %v562_v3 = vpop.permute.xlu1 %561 }
 0x123   : > { %v368_v52 = vld [vmem:[#allocation2] sm:$0xff] }
 0x124   : > { %v398_v53 = vadd.f32 %v395_v51, %v368_v52 }
 0x125   : > { %v529_v0 = vpop.f32.mrf.mxu3 }
 0x126   : > { %400 = vst.msk [vmem:[#allocation2] sm:$0xff] %vm399_vm4, %v398_v53 }
 0x127   : > { %v730_v18 = vpop.f32.mrf.mxu1 }
 0x129   : > { %v696_v15 = vpop.permute.xlu0 %695 }
 0x12d   : > { %v401_v56 = vld [vmem:[#allocation2] sm:$0xff]  ;;  %v663_v12 = vpop.f32.mrf.mxu3 }
 0x12e   : > { %v430_v57 = vadd.f32 %v428_v55, %v401_v56 }
 0x130   : > { %432 = vst.msk [vmem:[#allocation2] sm:$0xff] %vm431_vm5, %v430_v57 }
 0x131   : > { %v763_v21 = vpop.permute.xlu1 %762 }
 0x135   : > { %v797_v24 = vpop.f32.mrf.mxu3 }
 0x137   : > { %v435_v59 = vld [vmem:[#allocation2] sm:$0xff] }
 0x138   : > { %v465_v60 = vadd.f32 %v462_v58, %v435_v59 }
 0x13a   : > { %467 = vst.msk [vmem:[#allocation2] sm:$0xff] %vm466_vm6, %v465_v60 }
 0x141   : > { %v468_v62 = vld [vmem:[#allocation2] sm:$0xff] }
 0x142   : > { %v497_v63 = vadd.f32 %v495_v61, %v468_v62 }
 0x144   : > { %499 = vst.msk [vmem:[#allocation2] sm:$0xff] %vm498_vm7, %v497_v63 }
 0x14b   : > { %v502_v1 = vld [vmem:[#allocation2] sm:$0xff] }
 0x14c   : > { %v532_v2 = vadd.f32 %v529_v0, %v502_v1 }
 0x14e   : > { %534 = vst.msk [vmem:[#allocation2] sm:$0xff] %vm533_vm8, %v532_v2 }
 0x155   : > { %v535_v4 = vld [vmem:[#allocation2] sm:$0xff] }
 0x156   : > { %v564_v5 = vadd.f32 %v562_v3, %v535_v4 }
 0x158   : > { %566 = vst.msk [vmem:[#allocation2] sm:$0xff] %vm565_vm9, %v564_v5 }
 0x15f   : > { %v569_v7 = vld [vmem:[#allocation2] sm:$0xff] }
 0x160   : > { %v599_v8 = vadd.f32 %v596_v6, %v569_v7 }
 0x162   : > { %601 = vst.msk [vmem:[#allocation2] sm:$0xff] %vm600_vm10, %v599_v8 }
 0x169   : > { %v602_v10 = vld [vmem:[#allocation2] sm:$0xff] }
 0x16a   : > { %v631_v11 = vadd.f32 %v629_v9, %v602_v10 }
 0x16c   : > { %633 = vst.msk [vmem:[#allocation2] sm:$0xff] %vm632_vm11, %v631_v11 }
 0x173   : > { %v636_v13 = vld [vmem:[#allocation2] sm:$0xff] }
 0x174   : > { %v666_v14 = vadd.f32 %v663_v12, %v636_v13 }
 0x176   : > { %668 = vst.msk [vmem:[#allocation2] sm:$0xff] %vm667_vm12, %v666_v14 }
 0x17d   : > { %v669_v16 = vld [vmem:[#allocation2] sm:$0xff] }
 0x17e   : > { %v698_v17 = vadd.f32 %v696_v15, %v669_v16 }
 0x180   : > { %700 = vst.msk [vmem:[#allocation2] sm:$0xff] %vm699_vm13, %v698_v17 }
 0x187   : > { %v703_v19 = vld [vmem:[#allocation2] sm:$0xff] }
 0x188   : > { %v733_v20 = vadd.f32 %v730_v18, %v703_v19 }
 0x18a   : > { %735 = vst.msk [vmem:[#allocation2] sm:$0xff] %vm734_vm14, %v733_v20 }
 0x191   : > { %v736_v22 = vld [vmem:[#allocation2] sm:$0xff] }
 0x192   : > { %v765_v23 = vadd.f32 %v763_v21, %v736_v22 }
 0x194   : > { %767 = vst.msk [vmem:[#allocation2] sm:$0xff] %vm766_vm15, %v765_v23 }
 0x19b   : > { %v770_v25 = vld [vmem:[#allocation2] sm:$0xff] }
 0x19c   : > { %v800_v26 = vadd.f32 %v797_v24, %v770_v25 }
 0x19e   : > { %802 = vst.msk [vmem:[#allocation2] sm:$0xff] %vm801_vm0, %v800_v26 }
 0x1a5   : > { %v803_v28 = vld [vmem:[#allocation2] sm:$0xff] }
 0x1a6   : > { %v832_v29 = vadd.f32 %v830_v27, %v803_v28 }
 0x1a8   : > { %834 = vst.msk [vmem:[#allocation2] sm:$0xff] %vm833_vm1, %v832_v29 }
 0x1af   : > { %v835_v30 = vld [vmem:[#allocation2] sm:$0xff] }
 0x1b0   : > { %836 = vst [vmem:[%s240_s14] sm:$0xff] %v835_v30 }
 0x1b1   : > { %1115 = shalt.err (!%p1112_p9)
}
 0x1b2   : > { %1007 = dma.vmem_to_hbm [thread:$0]  (%p1269_p3), %s853_s11, 128, %s855_s24, %s838_s18  }
 0x1b3 PF: > { %p1013_p10 = scmp.ge.s32.totalorder %s1182_s22, 2  ;;  %s866_s6 = sand.u32 1, %s1154_s15  }
 0x1b4   : > { %s867_s27 = scalar_lea.sflag [#allocation4], %s866_s6 }
 0x1b5   : > { %p1010_p11 = pnand %p1013_p10, %p1278_p8 }
 0x1b7   : > { %p1011_p12 = pneg %p1010_p11 }
 0x1b9   : > { %1149 = dma.done.wait (%p1011_p12), %s867_s27, 128  }
 0x1ba   : > { %1151 = vsyncadd (%p1011_p12), %s867_s27, 4294967168  ;;  %s17_s22 = sadd.s32 1, %s1182_s22   ;;  %s1458_s15 = smov %s1158_s16 }
 0x1bb   : > { %p14_p13 = scmp.ge.s32.totalorder %s17_s22, 6   ;;  %s1459_s16 = smov %s1162_s17 }
 0x1bc   : > { %s1460_s17 = smov %s1287_s7  ;;  %s1461_s18 = smov %s1174_s20 }
 0x1bd   : > { %s1462_s19 = smov %s1178_s21  ;;  %s1463_s20 = smov %s1466_s25 }
 0x1be   : > { %s1464_s21 = smov %s1470_s26  ;;  %16 = sbr.rel (!%p14_p13) target bundleno = 5 (0x5), region = 82 }
 0x1c3   :  { %873 = vsyncpa [#allocation4], 1 }
 0x1c4   :  { %875 = vsyncpa [#allocation4 + $0x1], 1 }

</bundles_post_ra>
